<compile_context>
chip_gen: v7x
topology: tpu7x:2x2x1
jax: 0.10.0
libtpu: 0.0.40
codegen_flags: <defaults>
</compile_context>

<pallas_src>
import functools
import math

import jax
import jax.numpy as jnp
from jax.experimental import pallas as pl
from jax.experimental.pallas import tpu as pltpu

_MIB = 1024 * 1024


# ----------------------- per-generation VMEM budget ----------------------- #

def _vmem_limit_bytes():
    try:
        cap = pltpu.get_tpu_info().vmem_capacity_bytes
    except Exception:
        return 32 * _MIB  # safe fallback on any generation
    # ~75% of physical: v5e/v6e (128 MiB) -> 96 MiB, v7x (64 MiB) -> 48 MiB.
    return int(max(32 * _MIB, min(0.75 * cap, 100 * _MIB)))


_VMEM_LIMIT = _vmem_limit_bytes()


def _round_up(x, m):
    return ((x + m - 1) // m) * m


def _row_tile(m):
    """Row tile for row-parallel kernels; scales with the VMEM budget."""
    cap = 1024 if _VMEM_LIMIT >= 64 * _MIB else 512
    return _round_up(min(m, cap), 8)


# ---------------- single-buffered specs for resident weights -------------- #

def _probe_copy_kernel(x_ref, o_ref):
    o_ref[...] = x_ref[...]


@functools.lru_cache(maxsize=None)
def _single_buffer_supported():
    """Probe once whether pipeline_mode=pl.Buffered(1) compiles & runs."""
    try:
        spec = pl.BlockSpec((8, 128), lambda i: (0, 0),
                            pipeline_mode=pl.Buffered(1))
    except Exception:
        return False
    try:
        x = jnp.zeros((8, 128), jnp.float32)
        out = pl.pallas_call(
            _probe_copy_kernel,
            grid=(1,),
            in_specs=[spec],
            out_specs=pl.BlockSpec((8, 128), lambda i: (0, 0)),
            out_shape=jax.ShapeDtypeStruct((8, 128), jnp.float32),
        )(x)
        jax.block_until_ready(out)
        return True
    except Exception:
        return False


def _resident(block_shape, index_map):
    """BlockSpec for grid-resident (constant-index) operands: single buffer."""
    if _single_buffer_supported():
        return pl.BlockSpec(block_shape, index_map, pipeline_mode=pl.Buffered(1))
    return pl.BlockSpec(block_shape, index_map)


# ---------------------- head-tiled multi-head attention -------------------- #

def _mha_kernel(*refs, mask_mode, t_pad):
    if mask_mode == "explicit":
        (x_ref, m_ref, wq_ref, wk_ref, wv_ref, bq_ref, bk_ref, bv_ref,
         wo_ref, bo_ref, o_ref, attn_ref) = refs
    else:
        (x_ref, wq_ref, wk_ref, wv_ref, bq_ref, bk_ref, bv_ref,
         wo_ref, bo_ref, o_ref, attn_ref) = refs
        m_ref = None

    h = pl.program_id(1)
    x = x_ref[0]                                   # [T, D] f32, resident across h
    T, _ = x.shape
    dh = wq_ref.shape[2]
    scale = 1.0 / math.sqrt(dh)

    xb = x.astype(jnp.bfloat16)
    # This head's slice of the QKV projection (full projection computed exactly
    # once per batch element, split across the head grid axis; the head slice is
    # selected by the BlockSpec index_map, so no lane-axis slicing in-kernel).
    q = jnp.dot(xb, wq_ref[0], preferred_element_type=jnp.float32) + bq_ref[0]
    k = jnp.dot(xb, wk_ref[0], preferred_element_type=jnp.float32) + bk_ref[0]
    v = jnp.dot(xb, wv_ref[0], preferred_element_type=jnp.float32) + bv_ref[0]
    q = q * scale                                  # pre-scale q (O(T*dh), not O(T*T))

    s = jnp.dot(q.astype(jnp.bfloat16), k.astype(jnp.bfloat16).T,
                preferred_element_type=jnp.float32)            # [T, T] f32

    if mask_mode == "causal":
        row = jax.lax.broadcasted_iota(jnp.int32, (T, T), 0)
        col = jax.lax.broadcasted_iota(jnp.int32, (T, T), 1)
        s = jnp.where(col > row, -1e9, s)
    elif mask_mode == "explicit":
        s = jnp.where(m_ref[0] == 0.0, -1e9, s)    # convention: 1=keep, 0=mask
    # mask_mode == "none": all-ones mask -> skip masking entirely.

    s = s - jnp.max(s, axis=-1, keepdims=True)
    p = jnp.exp(s)
    # Exact normalization: the filters are part of the module's return value.
    p = p / jnp.sum(p, axis=-1, keepdims=True)

    # Lane-dense attention-filter store (padded columns are exact zeros).
    if t_pad > T:
        p_out = jnp.concatenate(
            [p, jnp.zeros((T, t_pad - T), jnp.float32)], axis=-1)
    else:
        p_out = p
    attn_ref[0, 0] = p_out.astype(attn_ref.dtype)

    ctx = jnp.dot(p.astype(jnp.bfloat16), v.astype(jnp.bfloat16),
                  preferred_element_type=jnp.float32)          # [T, dh]
    contrib = jnp.dot(ctx.astype(jnp.bfloat16), wo_ref[0],
                      preferred_element_type=jnp.float32)      # [T, D]

    # Accumulate the output projection per head directly in the resident output
    # block (index_map depends only on b -> stays in VMEM across the h axis).
    @pl.when(h == 0)
    def _():
        o_ref[0] = contrib + bo_ref[...]

    @pl.when(h != 0)
    def _():
        o_ref[0] = o_ref[0] + contrib


def fused_mha(x, p, n_heads, mask_mode="none", mask=None,
              filters_dtype=jnp.float32):
    """x: [B,T,D] f32.  Returns (out [B,T,D] f32, attn [B,H,T,T] filters_dtype)."""
    B, T, D = x.shape
    dh = D // n_heads
    t_pad = _round_up(T, 128)

    kernel = functools.partial(_mha_kernel, mask_mode=mask_mode, t_pad=t_pad)

    in_specs = [pl.BlockSpec((1, T, D), lambda b, h: (b, 0, 0))]   # resident over h
    args = [x]
    if mask_mode == "explicit":
        in_specs.append(pl.BlockSpec((1, T, T), lambda b, h: (b, 0, 0)))
        args.append(mask)
    in_specs += [
        pl.BlockSpec((1, D, dh), lambda b, h: (h, 0, 0)),   # wq (per-head slice)
        pl.BlockSpec((1, D, dh), lambda b, h: (h, 0, 0)),   # wk
        pl.BlockSpec((1, D, dh), lambda b, h: (h, 0, 0)),   # wv
        pl.BlockSpec((1, 1, dh), lambda b, h: (h, 0, 0)),   # bq
        pl.BlockSpec((1, 1, dh), lambda b, h: (h, 0, 0)),   # bk
        pl.BlockSpec((1, 1, dh), lambda b, h: (h, 0, 0)),   # bv
        pl.BlockSpec((1, dh, D), lambda b, h: (h, 0, 0)),   # wo (per-head rows)
        _resident((1, D), lambda b, h: (0, 0)),             # bo (grid-resident)
    ]
    args += [p["wq"], p["wk"], p["wv"], p["bq"], p["bk"], p["bv"],
             p["wo"], p["bo"]]

    out, attn = pl.pallas_call(
        kernel,
        grid=(B, n_heads),
        in_specs=in_specs,
        out_specs=(
            pl.BlockSpec((1, T, D), lambda b, h: (b, 0, 0)),
            pl.BlockSpec((1, 1, T, t_pad), lambda b, h: (b, h, 0, 0)),
        ),
        out_shape=(
            jax.ShapeDtypeStruct((B, T, D), jnp.float32),
            jax.ShapeDtypeStruct((B, n_heads, T, t_pad), filters_dtype),
        ),
        compiler_params=pltpu.CompilerParams(
            # head axis accumulates into the output block -> "arbitrary"
            dimension_semantics=("parallel", "arbitrary"),
            vmem_limit_bytes=_VMEM_LIMIT,
        ),
    )(*args)

    if t_pad != T:
        attn = attn[..., :T]
    return out, attn


# ------------------- feed-forward (+ optional fused LayerNorm) ------------- #

def _ffn_kernel(*refs, apply_ln, eps):
    if apply_ln:
        (x_ref, w1_ref, b1_ref, w2_ref, b2_ref, g_ref, be_ref, o_ref) = refs
    else:
        (x_ref, w1_ref, b1_ref, w2_ref, b2_ref, o_ref) = refs

    xb = x_ref[...].astype(jnp.bfloat16)
    hdn = jnp.dot(xb, w1_ref[...], preferred_element_type=jnp.float32) + b1_ref[...]
    hdn = jnp.maximum(hdn, 0.0)
    y = (jnp.dot(hdn.astype(jnp.bfloat16), w2_ref[...],
                 preferred_element_type=jnp.float32) + b2_ref[...])

    if apply_ln:
        # One-pass variance: E[x^2] - E[x]^2 (single extra reduction).
        mean = jnp.mean(y, axis=-1, keepdims=True)
        var = jnp.mean(y * y, axis=-1, keepdims=True) - mean * mean
        y = (y - mean) * jax.lax.rsqrt(var + eps) * g_ref[...] + be_ref[...]

    o_ref[...] = y


def feed_forward(x, w1, b1, w2, b2, ln_gamma=None, ln_beta=None, eps=1e-6):
    B, T, D = x.shape
    M = B * T
    d_ff = w1.shape[1]
    x2 = x.reshape(M, D)
    tm = _row_tile(M)
    apply_ln = ln_gamma is not None

    in_specs = [
        pl.BlockSpec((tm, D), lambda i: (i, 0)),
        _resident((D, d_ff), lambda i: (0, 0)),   # resident, single-buffered
        _resident((1, d_ff), lambda i: (0, 0)),
        _resident((d_ff, D), lambda i: (0, 0)),
        _resident((1, D), lambda i: (0, 0)),
    ]
    args = [x2, w1, b1.reshape(1, -1), w2, b2.reshape(1, -1)]
    if apply_ln:
        in_specs += [_resident((1, D), lambda i: (0, 0)),
                     _resident((1, D), lambda i: (0, 0))]
        args += [ln_gamma.reshape(1, D), ln_beta.reshape(1, D)]

    out = pl.pallas_call(
        functools.partial(_ffn_kernel, apply_ln=apply_ln, eps=eps),
        grid=(pl.cdiv(M, tm),),
        in_specs=in_specs,
        out_specs=pl.BlockSpec((tm, D), lambda i: (i, 0)),
        out_shape=jax.ShapeDtypeStruct((M, D), jnp.float32),
        compiler_params=pltpu.CompilerParams(
            dimension_semantics=("parallel",),
            vmem_limit_bytes=_VMEM_LIMIT,
        ),
    )(*args)
    return out.reshape(B, T, D)


# ------------------------------- module wrappers --------------------------- #

def decoder_layer_forward(x, lp, n_heads, self_mask_mode, dec_enc_mask_mode,
                          final_ln=None):
    x, f_self = fused_mha(x, lp["self_attn"], n_heads, mask_mode=self_mask_mode)
    x, f_enc = fused_mha(x, lp["enc_attn"], n_heads, mask_mode=dec_enc_mask_mode)
    if final_ln is None:
        x = feed_forward(x, lp["ff_w1"], lp["ff_b1"], lp["ff_w2"], lp["ff_b2"])
    else:
        g, b = final_ln  # final decoder LayerNorm fused into the FFN epilogue
        x = feed_forward(x, lp["ff_w1"], lp["ff_b1"], lp["ff_w2"], lp["ff_b2"],
                         ln_gamma=g, ln_beta=b, eps=1e-6)
    return x, f_self, f_enc


def decoder_forward(x, params, n_heads, self_mask_mode="causal",
                    dec_enc_mask_mode="none"):
    self_filters, enc_filters = [], []
    n = len(params["layers"])
    for li, lp in enumerate(params["layers"]):
        fuse_ln = (params["ln_gamma"], params["ln_beta"]) if li == n - 1 else None
        x, f_self, f_enc = decoder_layer_forward(
            x, lp, n_heads, self_mask_mode, dec_enc_mask_mode, final_ln=fuse_ln)
        self_filters.append(f_self)
        enc_filters.append(f_enc)
    return x, self_filters, enc_filters


# -------------------------------- parameter init --------------------------- #

def init_params(key, n_layers, d_model, d_ff, n_heads):
    dh = d_model // n_heads

    def dense(k, shape):
        # MXU operands stored in bf16; biases / LN params stay f32.
        return (0.02 * jax.random.normal(k, shape, jnp.float32)).astype(jnp.bfloat16)

    def mha_params(k):
        kq, kk, kv, ko = jax.random.split(k, 4)
        return {
            # Head-major projection weights: the head grid axis selects a slice
            # via BlockSpec index_map (no lane-axis slicing in the kernel).
            "wq": dense(kq, (n_heads, d_model, dh)),
            "wk": dense(kk, (n_heads, d_model, dh)),
            "wv": dense(kv, (n_heads, d_model, dh)),
            "bq": jnp.zeros((n_heads, 1, dh), jnp.float32),
            "bk": jnp.zeros((n_heads, 1, dh), jnp.float32),
            "bv": jnp.zeros((n_heads, 1, dh), jnp.float32),
            "wo": dense(ko, (n_heads, dh, d_model)),   # per-head rows of W_o
            "bo": jnp.zeros((1, d_model), jnp.float32),
        }

    layers = []
    for _ in range(n_layers):
        keys = jax.random.split(key, 5)
        key = keys[0]
        layers.append({
            "self_attn": mha_params(keys[1]),
            "enc_attn": mha_params(keys[2]),
            "ff_w1": dense(keys[3], (d_model, d_ff)),
            "ff_b1": jnp.zeros((d_ff,), jnp.float32),
            "ff_w2": dense(keys[4], (d_ff, d_model)),
            "ff_b2": jnp.zeros((d_model,), jnp.float32),
        })
    return {
        "layers": layers,
        "ln_gamma": jnp.ones((d_model,), jnp.float32),
        "ln_beta": jnp.zeros((d_model,), jnp.float32),
    }


# -------------------------------------- main -------------------------------- #

if __name__ == "__main__":
    B, T, D, H, D_FF, N_LAYERS = 2, 8, 32, 4, 64, 2

    key = jax.random.PRNGKey(0)
    k_x, k_p = jax.random.split(key)
    x = jax.random.normal(k_x, (B, T, D), jnp.float32)

    params = init_params(k_p, N_LAYERS, D, D_FF, H)

    # Self-attention mask is causal (generated in-kernel via iota); the
    # decoder-encoder mask is all-ones, so masking is skipped entirely.
    out, self_filters, enc_filters = decoder_forward(
        x, params, n_heads=H, self_mask_mode="causal", dec_enc_mask_mode="none"
    )
    jax.block_until_ready(out)
    jax.block_until_ready(self_filters)
    jax.block_until_ready(enc_filters)

    assert out.shape == (B, T, D)
    assert self_filters[0].shape == (B, H, T, T)
    assert enc_filters[0].shape == (B, H, T, T)
    # sanity: softmax rows sum to 1 (exact normalization path)
    assert abs(float(jnp.sum(self_filters[0][0, 0, 0])) - 1.0) < 1e-3
    print("KERNEL_OK")
</pallas_src>

<mosaic_0001>
module attributes {stable_mosaic.version = 11 : i64} {
  func.func @_probe_copy_kernel(%arg0: i32, %arg1: memref<8x128xf32, #tpu.memory_space<vmem>>, %arg2: memref<8x128xf32, #tpu.memory_space<vmem>>) attributes {dimension_semantics = [#tpu.dimension_semantics<arbitrary>], iteration_bounds = array<i64: 1>, scalar_prefetch = 0 : i64, scratch_operands = 0 : i64, tpu.core_type = #tpu.core_type<tc>, window_params = [{pipeline_mode = #tpu.pipeline_mode<synchronous>, transform_indices = @transform_0, window_bounds = array<i64: 8, 128>}, {pipeline_mode = #tpu.pipeline_mode<synchronous>, transform_indices = @transform_1, window_bounds = array<i64: 8, 128>}]} {
    %c0 = arith.constant 0 : index
    %c0_0 = arith.constant 0 : index
    %0 = vector.load %arg1[%c0, %c0_0] : memref<8x128xf32, #tpu.memory_space<vmem>>, vector<8x128xf32>
    %c0_1 = arith.constant 0 : index
    %c0_2 = arith.constant 0 : index
    %1 = vector.load %arg2[%c0_1, %c0_2] : memref<8x128xf32, #tpu.memory_space<vmem>>, vector<8x128xf32>
    tpu.vector_store %arg2[%c0_1, %c0_2], %0 {strides = array<i32>} : memref<8x128xf32, #tpu.memory_space<vmem>>, vector<8x128xf32>,
    return
  }
  func.func @transform_0(%arg0: i32) -> (i32, i32) {
    %c0_i32 = arith.constant 0 : i32
    %c0_i32_0 = arith.constant 0 : i32
    %c0_i32_1 = arith.constant 0 : i32
    return %c0_i32, %c0_i32_0 : i32, i32
  }
  func.func @transform_1(%arg0: i32) -> (i32, i32) {
    %c0_i32 = arith.constant 0 : i32
    %c0_i32_0 = arith.constant 0 : i32
    %c0_i32_1 = arith.constant 0 : i32
    return %c0_i32, %c0_i32_0 : i32, i32
  }
}

module attributes {stable_mosaic.version = 11 : i64} {
  func.func @_mha_kernel(%arg0: i32, %arg1: i32, %arg2: memref<1x8x32xf32, #tpu.memory_space<vmem>>, %arg3: memref<1x32x8xbf16, #tpu.memory_space<vmem>>, %arg4: memref<1x32x8xbf16, #tpu.memory_space<vmem>>, %arg5: memref<1x32x8xbf16, #tpu.memory_space<vmem>>, %arg6: memref<1x1x8xf32, #tpu.memory_space<vmem>>, %arg7: memref<1x1x8xf32, #tpu.memory_space<vmem>>, %arg8: memref<1x1x8xf32, #tpu.memory_space<vmem>>, %arg9: memref<1x8x32xbf16, #tpu.memory_space<vmem>>, %arg10: memref<1x32xf32, #tpu.memory_space<vmem>>, %arg11: memref<1x8x32xf32, #tpu.memory_space<vmem>>, %arg12: memref<1x1x8x128xf32, #tpu.memory_space<vmem>>) attributes {dimension_semantics = [#tpu.dimension_semantics<parallel>, #tpu.dimension_semantics<arbitrary>], iteration_bounds = array<i64: 2, 4>, scalar_prefetch = 0 : i64, scratch_operands = 0 : i64, tpu.core_type = #tpu.core_type<tc>, window_params = [{transform_indices = @transform_0, window_bounds = array<i64: 1, 8, 32>}, {transform_indices = @transform_1, window_bounds = array<i64: 1, 32, 8>}, {transform_indices = @transform_2, window_bounds = array<i64: 1, 32, 8>}, {transform_indices = @transform_3, window_bounds = array<i64: 1, 32, 8>}, {transform_indices = @transform_4, window_bounds = array<i64: 1, 1, 8>}, {transform_indices = @transform_5, window_bounds = array<i64: 1, 1, 8>}, {transform_indices = @transform_6, window_bounds = array<i64: 1, 1, 8>}, {transform_indices = @transform_7, window_bounds = array<i64: 1, 8, 32>}, {pipeline_mode = #tpu.pipeline_mode<synchronous>, transform_indices = @transform_8, window_bounds = array<i64: 1, 32>}, {transform_indices = @transform_9, window_bounds = array<i64: 1, 8, 32>}, {transform_indices = @transform_10, window_bounds = array<i64: 1, 1, 8, 128>}]} {
    %c0 = arith.constant 0 : index
    %c0_0 = arith.constant 0 : index
    %c0_1 = arith.constant 0 : index
    %0 = vector.load %arg2[%c0, %c0_0, %c0_1] : memref<1x8x32xf32, #tpu.memory_space<vmem>>, vector<1x8x32xf32>
    %1 = vector.shape_cast %0 : vector<1x8x32xf32> to vector<8x32xf32>
    %2 = arith.truncf %1 : vector<8x32xf32> to vector<8x32xbf16>
    %c0_2 = arith.constant 0 : index
    %c0_3 = arith.constant 0 : index
    %c0_4 = arith.constant 0 : index
    %3 = vector.load %arg3[%c0_2, %c0_3, %c0_4] : memref<1x32x8xbf16, #tpu.memory_space<vmem>>, vector<1x32x8xbf16>
    %4 = vector.shape_cast %3 : vector<1x32x8xbf16> to vector<32x8xbf16>
    %cst = arith.constant dense<0.000000e+00> : vector<8x8xf32>
    %5 = tpu.matmul %2, %4, %cst {dimension_numbers = #tpu.dot_dimension_numbers<[1], [0], [0], [1], [0, 0, 1, 1], [], []>} : vector<8x32xbf16>, vector<32x8xbf16>, vector<8x8xf32> -> vector<8x8xf32>
    %c0_5 = arith.constant 0 : index
    %c0_6 = arith.constant 0 : index
    %c0_7 = arith.constant 0 : index
    %6 = vector.load %arg6[%c0_5, %c0_6, %c0_7] : memref<1x1x8xf32, #tpu.memory_space<vmem>>, vector<1x1x8xf32>
    %7 = vector.shape_cast %6 : vector<1x1x8xf32> to vector<1x8xf32>
    %8 = vector.broadcast %7 : vector<1x8xf32> to vector<8x8xf32>
    %9 = arith.addf %5, %8 : vector<8x8xf32>
    %c0_8 = arith.constant 0 : index
    %c0_9 = arith.constant 0 : index
    %c0_10 = arith.constant 0 : index
    %10 = vector.load %arg4[%c0_8, %c0_9, %c0_10] : memref<1x32x8xbf16, #tpu.memory_space<vmem>>, vector<1x32x8xbf16>
    %11 = vector.shape_cast %10 : vector<1x32x8xbf16> to vector<32x8xbf16>
    %cst_11 = arith.constant dense<0.000000e+00> : vector<8x8xf32>
    %12 = tpu.matmul %2, %11, %cst_11 {dimension_numbers = #tpu.dot_dimension_numbers<[1], [0], [0], [1], [0, 0, 1, 1], [], []>} : vector<8x32xbf16>, vector<32x8xbf16>, vector<8x8xf32> -> vector<8x8xf32>
    %c0_12 = arith.constant 0 : index
    %c0_13 = arith.constant 0 : index
    %c0_14 = arith.constant 0 : index
    %13 = vector.load %arg7[%c0_12, %c0_13, %c0_14] : memref<1x1x8xf32, #tpu.memory_space<vmem>>, vector<1x1x8xf32>
    %14 = vector.shape_cast %13 : vector<1x1x8xf32> to vector<1x8xf32>
    %15 = vector.broadcast %14 : vector<1x8xf32> to vector<8x8xf32>
    %16 = arith.addf %12, %15 : vector<8x8xf32>
    %c0_15 = arith.constant 0 : index
    %c0_16 = arith.constant 0 : index
    %c0_17 = arith.constant 0 : index
    %17 = vector.load %arg5[%c0_15, %c0_16, %c0_17] : memref<1x32x8xbf16, #tpu.memory_space<vmem>>, vector<1x32x8xbf16>
    %18 = vector.shape_cast %17 : vector<1x32x8xbf16> to vector<32x8xbf16>
    %cst_18 = arith.constant dense<0.000000e+00> : vector<8x8xf32>
    %19 = tpu.matmul %2, %18, %cst_18 {dimension_numbers = #tpu.dot_dimension_numbers<[1], [0], [0], [1], [0, 0, 1, 1], [], []>} : vector<8x32xbf16>, vector<32x8xbf16>, vector<8x8xf32> -> vector<8x8xf32>
    %c0_19 = arith.constant 0 : index
    %c0_20 = arith.constant 0 : index
    %c0_21 = arith.constant 0 : index
    %20 = vector.load %arg8[%c0_19, %c0_20, %c0_21] : memref<1x1x8xf32, #tpu.memory_space<vmem>>, vector<1x1x8xf32>
    %21 = vector.shape_cast %20 : vector<1x1x8xf32> to vector<1x8xf32>
    %22 = vector.broadcast %21 : vector<1x8xf32> to vector<8x8xf32>
    %23 = arith.addf %19, %22 : vector<8x8xf32>
    %cst_22 = arith.constant 0.353553385 : f32
    %24 = vector.broadcast %cst_22 : f32 to vector<8x8xf32>
    %25 = arith.mulf %9, %24 : vector<8x8xf32>
    %26 = arith.truncf %25 : vector<8x8xf32> to vector<8x8xbf16>
    %27 = arith.truncf %16 : vector<8x8xf32> to vector<8x8xbf16>
    %28 = tpu.transpose %27, [1, 0] : vector<8x8xbf16> -> vector<8x8xbf16>
    %cst_23 = arith.constant dense<0.000000e+00> : vector<8x8xf32>
    %29 = tpu.matmul %26, %28, %cst_23 {dimension_numbers = #tpu.dot_dimension_numbers<[1], [0], [0], [1], [0, 0, 1, 1], [], []>} : vector<8x8xbf16>, vector<8x8xbf16>, vector<8x8xf32> -> vector<8x8xf32>
    %30 = tpu.iota {dimensions = array<i32: 0>} : vector<8x8xi32>
    %31 = tpu.iota {dimensions = array<i32: 1>} : vector<8x8xi32>
    %32 = arith.cmpi sgt, %31, %30 : vector<8x8xi32>
    %cst_24 = arith.constant -1.000000e+09 : f32
    %33 = vector.broadcast %cst_24 : f32 to vector<8x8xf32>
    %34 = arith.select %32, %33, %29 : vector<8x8xi1>, vector<8x8xf32>
    %cst_25 = arith.constant dense<0xFF800000> : vector<8xf32>
    %35 = vector.multi_reduction <maximumf>, %34, %cst_25 [1] : vector<8x8xf32> to vector<8xf32>
    %36 = vector.shape_cast %35 : vector<8xf32> to vector<8x1xf32>
    %37 = vector.broadcast %36 : vector<8x1xf32> to vector<8x8xf32>
    %38 = arith.subf %34, %37 : vector<8x8xf32>
    %39 = math.exp %38 : vector<8x8xf32>
    %cst_26 = arith.constant dense<0.000000e+00> : vector<8xf32>
    %40 = vector.multi_reduction <add>, %39, %cst_26 [1] : vector<8x8xf32> to vector<8xf32>
    %41 = vector.shape_cast %40 : vector<8xf32> to vector<8x1xf32>
    %42 = vector.broadcast %41 : vector<8x1xf32> to vector<8x8xf32>
    %43 = arith.divf %39, %42 : vector<8x8xf32>
    %cst_27 = arith.constant 0.000000e+00 : f32
    %44 = vector.broadcast %cst_27 : f32 to vector<8x120xf32>
    %45 = tpu.concatenate %43, %44 in 1 : vector<8x8xf32>, vector<8x120xf32> -> vector<8x128xf32>
    %c0_28 = arith.constant 0 : index
    %c0_29 = arith.constant 0 : index
    %c0_30 = arith.constant 0 : index
    %c0_31 = arith.constant 0 : index
    %46 = vector.load %arg12[%c0_28, %c0_29, %c0_30, %c0_31] : memref<1x1x8x128xf32, #tpu.memory_space<vmem>>, vector<1x1x8x128xf32>
    %47 = vector.shape_cast %46 : vector<1x1x8x128xf32> to vector<8x128xf32>
    %48 = vector.shape_cast %45 : vector<8x128xf32> to vector<1x1x8x128xf32>
    tpu.vector_store %arg12[%c0_28, %c0_29, %c0_30, %c0_31], %48 {strides = array<i32>} : memref<1x1x8x128xf32, #tpu.memory_space<vmem>>, vector<1x1x8x128xf32>,
    %49 = arith.truncf %43 : vector<8x8xf32> to vector<8x8xbf16>
    %50 = arith.truncf %23 : vector<8x8xf32> to vector<8x8xbf16>
    %cst_32 = arith.constant dense<0.000000e+00> : vector<8x8xf32>
    %51 = tpu.matmul %49, %50, %cst_32 {dimension_numbers = #tpu.dot_dimension_numbers<[1], [0], [0], [1], [0, 0, 1, 1], [], []>} : vector<8x8xbf16>, vector<8x8xbf16>, vector<8x8xf32> -> vector<8x8xf32>
    %52 = arith.truncf %51 : vector<8x8xf32> to vector<8x8xbf16>
    %c0_33 = arith.constant 0 : index
    %c0_34 = arith.constant 0 : index
    %c0_35 = arith.constant 0 : index
    %53 = vector.load %arg9[%c0_33, %c0_34, %c0_35] : memref<1x8x32xbf16, #tpu.memory_space<vmem>>, vector<1x8x32xbf16>
    %54 = vector.shape_cast %53 : vector<1x8x32xbf16> to vector<8x32xbf16>
    %cst_36 = arith.constant dense<0.000000e+00> : vector<8x32xf32>
    %55 = tpu.matmul %52, %54, %cst_36 {dimension_numbers = #tpu.dot_dimension_numbers<[1], [0], [0], [1], [0, 0, 1, 1], [], []>} : vector<8x8xbf16>, vector<8x32xbf16>, vector<8x32xf32> -> vector<8x32xf32>
    %c0_i32 = arith.constant 0 : i32
    %56 = arith.cmpi eq, %arg1, %c0_i32 : i32
    %57 = arith.extui %56 : i1 to i32
    %c0_i32_37 = arith.constant 0 : i32
    %58 = arith.cmpi ne, %57, %c0_i32_37 : i32
    scf.if %58 {
      %c0_40 = arith.constant 0 : index
      %c0_41 = arith.constant 0 : index
      %62 = vector.load %arg10[%c0_40, %c0_41] : memref<1x32xf32, #tpu.memory_space<vmem>>, vector<1x32xf32>
      %63 = vector.broadcast %62 : vector<1x32xf32> to vector<8x32xf32>
      %64 = arith.addf %55, %63 : vector<8x32xf32>
      %c0_42 = arith.constant 0 : index
      %c0_43 = arith.constant 0 : index
      %c0_44 = arith.constant 0 : index
      %65 = vector.load %arg11[%c0_42, %c0_43, %c0_44] : memref<1x8x32xf32, #tpu.memory_space<vmem>>, vector<1x8x32xf32>
      %66 = vector.shape_cast %65 : vector<1x8x32xf32> to vector<8x32xf32>
      %67 = vector.shape_cast %64 : vector<8x32xf32> to vector<1x8x32xf32>
      tpu.vector_store %arg11[%c0_42, %c0_43, %c0_44], %67 {strides = array<i32>} : memref<1x8x32xf32, #tpu.memory_space<vmem>>, vector<1x8x32xf32>,
    } else {
    }
    %c0_i32_38 = arith.constant 0 : i32
    %59 = arith.cmpi ne, %arg1, %c0_i32_38 : i32
    %60 = arith.extui %59 : i1 to i32
    %c0_i32_39 = arith.constant 0 : i32
    %61 = arith.cmpi ne, %60, %c0_i32_39 : i32
    scf.if %61 {
      %c0_40 = arith.constant 0 : index
      %c0_41 = arith.constant 0 : index
      %c0_42 = arith.constant 0 : index
      %62 = vector.load %arg11[%c0_40, %c0_41, %c0_42] : memref<1x8x32xf32, #tpu.memory_space<vmem>>, vector<1x8x32xf32>
      %63 = vector.shape_cast %62 : vector<1x8x32xf32> to vector<8x32xf32>
      %64 = arith.addf %63, %55 : vector<8x32xf32>
      %c0_43 = arith.constant 0 : index
      %c0_44 = arith.constant 0 : index
      %c0_45 = arith.constant 0 : index
      %65 = vector.load %arg11[%c0_43, %c0_44, %c0_45] : memref<1x8x32xf32, #tpu.memory_space<vmem>>, vector<1x8x32xf32>
      %66 = vector.shape_cast %65 : vector<1x8x32xf32> to vector<8x32xf32>
      %67 = vector.shape_cast %64 : vector<8x32xf32> to vector<1x8x32xf32>
      tpu.vector_store %arg11[%c0_43, %c0_44, %c0_45], %67 {strides = array<i32>} : memref<1x8x32xf32, #tpu.memory_space<vmem>>, vector<1x8x32xf32>,
    } else {
    }
    return
  }
  func.func @transform_0(%arg0: i32, %arg1: i32) -> (i32, i32, i32) {
    %c0_i32 = arith.constant 0 : i32
    %c0_i32_0 = arith.constant 0 : i32
    %c0_i32_1 = arith.constant 0 : i32
    return %arg0, %c0_i32, %c0_i32_0 : i32, i32, i32
  }
  func.func @transform_1(%arg0: i32, %arg1: i32) -> (i32, i32, i32) {
    %c0_i32 = arith.constant 0 : i32
    %c0_i32_0 = arith.constant 0 : i32
    %c0_i32_1 = arith.constant 0 : i32
    return %arg1, %c0_i32, %c0_i32_0 : i32, i32, i32
  }
  func.func @transform_2(%arg0: i32, %arg1: i32) -> (i32, i32, i32) {
    %c0_i32 = arith.constant 0 : i32
    %c0_i32_0 = arith.constant 0 : i32
    %c0_i32_1 = arith.constant 0 : i32
    return %arg1, %c0_i32, %c0_i32_0 : i32, i32, i32
  }
  func.func @transform_3(%arg0: i32, %arg1: i32) -> (i32, i32, i32) {
    %c0_i32 = arith.constant 0 : i32
    %c0_i32_0 = arith.constant 0 : i32
    %c0_i32_1 = arith.constant 0 : i32
    return %arg1, %c0_i32, %c0_i32_0 : i32, i32, i32
  }
  func.func @transform_4(%arg0: i32, %arg1: i32) -> (i32, i32, i32) {
    %c0_i32 = arith.constant 0 : i32
    %c0_i32_0 = arith.constant 0 : i32
    %c0_i32_1 = arith.constant 0 : i32
    return %arg1, %c0_i32, %c0_i32_0 : i32, i32, i32
  }
  func.func @transform_5(%arg0: i32, %arg1: i32) -> (i32, i32, i32) {
    %c0_i32 = arith.constant 0 : i32
    %c0_i32_0 = arith.constant 0 : i32
    %c0_i32_1 = arith.constant 0 : i32
    return %arg1, %c0_i32, %c0_i32_0 : i32, i32, i32
  }
  func.func @transform_6(%arg0: i32, %arg1: i32) -> (i32, i32, i32) {
    %c0_i32 = arith.constant 0 : i32
    %c0_i32_0 = arith.constant 0 : i32
    %c0_i32_1 = arith.constant 0 : i32
    return %arg1, %c0_i32, %c0_i32_0 : i32, i32, i32
  }
  func.func @transform_7(%arg0: i32, %arg1: i32) -> (i32, i32, i32) {
    %c0_i32 = arith.constant 0 : i32
    %c0_i32_0 = arith.constant 0 : i32
    %c0_i32_1 = arith.constant 0 : i32
    return %arg1, %c0_i32, %c0_i32_0 : i32, i32, i32
  }
  func.func @transform_8(%arg0: i32, %arg1: i32) -> (i32, i32) {
    %c0_i32 = arith.constant 0 : i32
    %c0_i32_0 = arith.constant 0 : i32
    %c0_i32_1 = arith.constant 0 : i32
    return %c0_i32, %c0_i32_0 : i32, i32
  }
  func.func @transform_9(%arg0: i32, %arg1: i32) -> (i32, i32, i32) {
    %c0_i32 = arith.constant 0 : i32
    %c0_i32_0 = arith.constant 0 : i32
    %c0_i32_1 = arith.constant 0 : i32
    return %arg0, %c0_i32, %c0_i32_0 : i32, i32, i32
  }
  func.func @transform_10(%arg0: i32, %arg1: i32) -> (i32, i32, i32, i32) {
    %c0_i32 = arith.constant 0 : i32
    %c0_i32_0 = arith.constant 0 : i32
    %c0_i32_1 = arith.constant 0 : i32
    return %arg0, %arg1, %c0_i32, %c0_i32_0 : i32, i32, i32, i32
  }
}

</mosaic_0001>

<bundles_post_ra>
// kernel: tpu_custom_call.1
= control target key start
LH: loop header
LB: loop body
LE: loop exit
PB: predicated region body
PF: predicated region fallthrough
CT: control target
= control target key end

     0   :  { %6 = vsyncpa [#allocation3], 0  ;;  %s124_s0 = inlined_call_operand.hbm [shape: f32[8,128], index: 0, kind: input, shape index: {}]   ;;  %s125_s1 = inlined_call_operand.hbm [shape: f32[8,128], index: 1, kind: output, shape index: {}]  }
   0x1   :  { %7 = vsyncpa [#allocation4], 0  ;;  %s88_s6 = smov [#allocation2]   ;;  %s40_s10 = scalar_lea.hbm %s124_s0, 128 }
   0x2   :  { %s14_s7 = sshll.u32 %s88_s6, 4  ;;  %p41_p0 = scmp.ne.s32.totalorder %s124_s0, %s40_s10  ;;  %s15_s7 = int_to_ptr.vmem [resolvable:$true] %s14_s7 }
   0x3   :  { %p44_p1 = scmp.lt.u32.totalorder %s40_s10, %s124_s0 }
   0x5   :  { %p46_p2 = pnand %p44_p1, %p41_p0 }
   0x7   :  { %49 = shalt.err (!%p46_p2)
}
   0x8   :  { %s50_s15 = scalar_lea.vmem %s15_s7, 128  ;;  %p55_p4 = scmp.lt.s32.totalorder %s15_s7, %s15_s7 }
   0x9   :  { %p51_p3 = scmp.ne.s32.totalorder %s15_s7, %s50_s15  ;;  %p56_p5 = scmp.lt.s32.totalorder %s50_s15, %s50_s15 }
   0xb   :  { %p57_p6 = por %p56_p5, %p55_p4 }
   0xd   :  { %p58_p7 = pnand %p57_p6, %p51_p3 }
   0xf   :  { %61 = shalt.err (!%p58_p7)
}
  0x10   :  { %17 = dma.hbm_to_vmem [thread:$0]  %s124_s0, 128, %s15_s7, [#allocation3]  }
  0x11   :  { %84 = dma.done.wait [#allocation3], 128  }
  0x12   :  { %85 = vsyncadd [#allocation3], 4294967168  ;;  %s89_s18 = smov [#allocation5]   ;;  %v21_v0 = vld [vmem:[#allocation2] sm:$0xff] }
  0x13   :  { %s29_s19 = sshll.u32 %s89_s18, 4  ;;  %22 = vst [vmem:[#allocation5] sm:$0xff] %v21_v0  ;;  %s30_s19 = int_to_ptr.vmem [resolvable:$true] %s29_s19 }
  0x14   :  { %s62_s20 = scalar_lea.vmem %s30_s19, 128  ;;  %p67_p9 = scmp.lt.s32.totalorder %s30_s19, %s30_s19 }
  0x15   :  { %p63_p8 = scmp.ne.s32.totalorder %s30_s19, %s62_s20  ;;  %p68_p10 = scmp.lt.s32.totalorder %s62_s20, %s62_s20 }
  0x17   :  { %p69_p11 = por %p68_p10, %p67_p9 }
  0x19   :  { %p70_p12 = pnand %p69_p11, %p63_p8 }
  0x1b   :  { %73 = shalt.err (!%p70_p12)
}
  0x1c   :  { %s74_s23 = scalar_lea.hbm %s125_s1, 128 }
  0x1d   :  { %p75_p13 = scmp.ne.s32.totalorder %s125_s1, %s74_s23  ;;  %p78_p0 = scmp.lt.u32.totalorder %s74_s23, %s125_s1 }
  0x1f   :  { %p80_p1 = pnand %p78_p0, %p75_p13 }
  0x21   :  { %83 = shalt.err (!%p80_p1)
}
  0x22   :  { %32 = dma.vmem_to_hbm [thread:$0]  %s30_s19, 128, %s125_s1, [#allocation4]  }
  0x23   :  { %86 = dma.done.wait [#allocation4], 128  }
  0x24   :  { %87 = vsyncadd [#allocation4], 4294967168 }
  0x25   :  { %36 = vsyncpa [#allocation3], 1 }
  0x26   :  { %37 = vsyncpa [#allocation4], 1 }

// kernel: tpu_custom_call.1
= control target key start
LH: loop header
LB: loop body
LE: loop exit
PB: predicated region body
PF: predicated region fallthrough
CT: control target
= control target key end

     0   :  { %s1818_s0 = inlined_call_operand.vmem [shape: f32[2,8,32], index: 0, kind: input, shape index: {}]   ;;  %s1819_s1 = inlined_call_operand.vmem [shape: bf16[4,32,8], index: 1, kind: input, shape index: {}]   ;;  %s1820_s2 = inlined_call_operand.vmem [shape: bf16[4,32,8], index: 2, kind: input, shape index: {}]   ;;  %s1821_s3 = inlined_call_operand.vmem [shape: bf16[4,32,8], index: 3, kind: input, shape index: {}]   ;;  %s1822_s4 = inlined_call_operand.vmem [shape: f32[4,1,8], index: 4, kind: input, shape index: {}]   ;;  %s1823_s5 = inlined_call_operand.vmem [shape: f32[4,1,8], index: 5, kind: input, shape index: {}]   ;;  %s1824_s6 = inlined_call_operand.vmem [shape: f32[4,1,8], index: 6, kind: input, shape index: {}]   ;;  %s1825_s7 = inlined_call_operand.vmem [shape: bf16[4,8,32], index: 7, kind: input, shape index: {}]   ;;  %s1826_s8 = inlined_call_operand.vmem [shape: f32[1,32], index: 8, kind: input, shape index: {}]   ;;  %s1827_s9 = inlined_call_operand.hbm [shape: f32[2,8,32], index: 9, kind: output, shape index: {0}]   ;;  %s1828_s10 = inlined_call_operand.hbm [shape: f32[2,4,8,128], index: 10, kind: output, shape index: {1}]  }
   0x1   :  { %1843 = sst [smem:[#allocation18_spill]] %s1818_s0 }
   0x2   :  { %1844 = sst [smem:[#allocation19_spill]] %s1819_s1 }
   0x3   :  { %1845 = sst [smem:[#allocation20_spill]] %s1820_s2 }
   0x4   :  { %1846 = sst [smem:[#allocation21_spill]] %s1821_s3 }
   0x5   :  { %1847 = sst [smem:[#allocation22_spill]] %s1827_s9 }
   0x6   :  { %1848 = sst [smem:[#allocation23_spill]] %s1828_s10 }
   0x7   :  { %16 = vsyncpa [#allocation3], 0 }
   0x8   :  { %18 = vsyncpa [#allocation3 + $0x1], 0 }
   0x9   :  { %19 = vsyncpa [#allocation5], 0 }
   0xa   :  { %21 = vsyncpa [#allocation5 + $0x1], 0  ;;  %s1517_s13 = smov 0   ;;  %s1519_s14 = smov 0  }
   0xb   :  { %s1521_s15 = smov 0   ;;  %s1523_s16 = smov 0  }
   0xc   :  { %s1525_s17 = smov 0   ;;  %s1527_s18 = smov 0  }
   0xd   :  { %s1529_s19 = smov 0   ;;  %s1531_s20 = smov 0  }
   0xe   :  { %s1533_s21 = smov 0   ;;  %s1535_s22 = smov 0  }
   0xf   :  { %s1537_s23 = smov 0  }
  0x10 LB: > { %1849 = sst [smem:[#allocation8_spill]] %s1424_s15  ;;  %s1094_s24 = sadd.s32 4294967295, %s1456_s23   ;;  %s1456_s23 = sphi %s1537_s23, %s27_s23   ;;  %s1452_s22 = sphi %s1535_s22, %s1884_s22   ;;  %s1448_s21 = sphi %s1533_s21, %s1883_s21   ;;  %s1444_s20 = sphi %s1531_s20, %s1882_s20   ;;  %s1440_s19 = sphi %s1529_s19, %s1881_s19   ;;  %s1436_s18 = sphi %s1527_s18, %s1880_s18   ;;  %s1432_s17 = sphi %s1525_s17, %s1888_s17   ;;  %s1428_s16 = sphi %s1523_s16, %s1887_s16   ;;  %s1424_s15 = sphi %s1521_s15, %s1878_s15   ;;  %s1420_s14 = sphi %s1519_s14, %s1886_s14   ;;  %s1416_s13 = sphi %s1517_s13, %s1885_s13  }
  0x11   : > { %1850 = sst [smem:[#allocation9_spill]] %s1428_s16  ;;  %s1095_s25 = sadd.s32 4294967294, %s1456_s23  }
  0x12   : > { %1851 = sst [smem:[#allocation10_spill]] %s1436_s18  ;;  %s36_s26 = sadd.s32 1, %s1448_s21 }
  0x13   : > { %1852 = sst [smem:[#allocation11_spill]] %s1448_s21  ;;  %s39_s27 = sadd.s32 1, %s1452_s22 }
  0x14   : > { %1853 = sst [smem:[#allocation12_spill]] %s1452_s22  ;;  %p37_p0 = scmp.ge.s32.totalorder %s36_s26, 4 }
  0x15   : > { %s275_s28 = sadd.s32 1, %s1436_s18  ;;  %p285_p1 = scmp.ne.s32.totalorder %s1436_s18, %s1432_s17 }
  0x16   : > { %p1579_p2 = scmp.eq.s32.totalorder %s1094_s24, 7  ;;  %s1890_s26 = smov (%p37_p0, %s36_s26), 0 }
  0x17   : > { %1855 = sst [smem:[#allocation13_spill]] %s1890_s26  ;;  %s1892_s27 = smov (!%p37_p0, %s39_s27), %s1452_s22 }
  0x18   : > { %p1588_p3 = por %p1579_p2, %p285_p1  ;;  %p291_p4 = scmp.ne.s32.totalorder %s1432_s17, %s1428_s16 }
  0x19   : > { %p41_p5 = scmp.ge.s32.totalorder %s1892_s27, 2  ;;  %p1594_p6 = scmp.eq.s32.totalorder %s1095_s25, 7 }
  0x1a   : > { %s1856_s30 = scalar_select %p1588_p3, 1, 0 }
  0x1b   : > { %s299_s12 = ssub.s32 %s1448_s21, %s1890_s26  ;;  %s303_s24 = sadd.s32 1, %s1424_s15 }
  0x1c   : > { %1857 = sst [smem:[#allocation14_spill]] %s1856_s30  ;;  %s1894_s27 = smov (%p41_p5, %s1892_s27), 0 }
  0x1d   : > { %1859 = sst [smem:[#allocation15_spill]] %s1894_s27  ;;  %p1605_p7 = por %p1594_p6, %p291_p4 }
  0x1e   : > { %p313_p8 = scmp.ne.s32.totalorder %s1424_s15, %s1420_s14  ;;  %s272_s16 = ssub.s32 %s1452_s22, %s1894_s27 }
  0x1f   : > { %p319_p9 = scmp.ne.s32.totalorder %s1420_s14, %s1416_s13  ;;  %p273_p10 = scmp.eq.s32.totalorder %s272_s16, 0 }
  0x20   : > { %s300_s25 = sor.u32 %s299_s12, %s272_s16  ;;  %p1617_p12 = por %p313_p8, %p1579_p2 }
  0x21   : > { %p301_p11 = scmp.eq.s32.totalorder %s300_s25, 0  ;;  %p1629_p13 = por %p319_p9, %p1594_p6 }
  0x22   : > { %s1622_s26 = scalar_select %p273_p10, %s1436_s18, %s275_s28  }
  0x23   : > { %s1625_s21 = scalar_select %p301_p11, %s1424_s15, %s303_s24  }
  0x24   : > { %1862 = sst [smem:[#allocation16_spill]] %s1622_s26  ;;  %p1098_p0 = scmp.ge.s32.totalorder %s1456_s23, 1 }
  0x25   : > { %1863 = sst [smem:[#allocation17_spill]] %s1625_s21  ;;  %p397_p1 = scmp.lt.s32.totalorder %s1456_s23, 9 }
  0x26   : > { %s1864_s30 = scalar_select %p1629_p13, 1, 0 }
  0x27   : > { %p398_p4 = pnand %p1098_p0, %p397_p1 }
  0x28   : > { %p471_p2 = scmp.lt.s32.totalorder (!%p398_p4), %s1440_s19, 3  ;;  %s1836_s16 = sand.u32 (!%p398_p4), 1, %s1432_s17   ;;  %v1458_v0 = vmov (!%p398_p4), 0.0   ;;  %vm1459_vm0 = vmmov (!%p398_p4), 0   ;;  %vm525_vm1 = vcmask (!%p398_p4), 261120   ;;  %vm698_vm2 = vcmask (!%p398_p4), 64512  }
  0x29   : > { %401 = sbr.rel (%p398_p4) target bundleno = 1306 (0x51a), region = 56  ;;  %1160 = vmatprep.subr.bf16.mxu1 (!%p398_p4), %v1458_v0  ;;  %s1640_s28 = sshll.u32 (!%p398_p4), %s1836_s16, 3  ;;  %1152 = vmatprep.subr.bf16.mxu0 (!%p398_p4), %v1458_v0  ;;  %v745_v25 = vlaneseq (!%p398_p4)  ;;  %vm769_vm4 = vcmask (!%p398_p4), 1043456  }
  0x2a   : > { %1164 = vmatprep.mubr.msk.bf16.mxu1 (!%p398_p4), %vm1459_vm0, %v1458_v0  ;;  %1156 = vmatprep.mubr.msk.bf16.mxu0 (!%p398_p4), %vm1459_vm0, %v1458_v0  ;;  %p467_p5 = scmp.lt.s32.totalorder (!%p398_p4), %s1444_s20, 1  ;;  %s1865_s2 = sld [smem:[#allocation20_spill]] (!%p398_p4) }
  0x2b   : > { %s1866_s1 = sld [smem:[#allocation19_spill]] (!%p398_p4)  ;;  %s1867_s3 = sld [smem:[#allocation21_spill]] (!%p398_p4)  ;;  %v746_v26 = vshrl.u32 (!%p398_p4), %v745_v25, 7  ;;  %v748_v27 = vand.u32 (!%p398_p4), 127, %v745_v25 }
  0x2c   : > { %s1868_s0 = sld [smem:[#allocation18_spill]] (!%p398_p4)  ;;  %p1124_p6 = scmp.ne.s32.totalorder (!%p398_p4), %s1440_s19, 0 }
  0x2d   : > { %vm749_vm3 = vcmp.gt.s32.totalorder (!%p398_p4), %v748_v27, %v746_v26 }
  0x30   : > { %s1644_s29 = scalar_select %p471_p2, %s1440_s19, 3 }
  0x31   : > { %s468_s26 = scalar_select %p467_p5, %s1444_s20, 1 }
  0x32   : > { %s1134_s11 = sshll.u32 %s1644_s29, 4  ;;  %s494_s27 = scalar_lea.vmem %s1824_s6, %s1644_s29  ;;  %v1125_v63 = vld [vmem:[%s1826_s8] ss:$0 sm:$0xff] (!%p1124_p6) }
  0x33   : > { %s480_s25 = scalar_lea.vmem %s1865_s2, %s1134_s11  ;;  %s475_s22 = scalar_lea.vmem %s1866_s1, %s1134_s11  ;;  %v1117_v42 = vld [vmem:[%s494_s27] ss:$0 sm:$0xff] }
  0x34   : > { %v1296_v1 = vld [vmem:[%s480_s25] sm:$0xff]   ;;  %v1298_v3 = vld [vmem:[%s480_s25 + $0x8] sm:$0xff]   ;;  %s1662_s15 = scalar_lea.vmem %s1867_s3, %s1134_s11  ;;  %s1101_s12 = sshll.u32 %s468_s26, 3 }
  0x35   : > { %v1297_v2 = vld [vmem:[%s475_s22] sm:$0xff]   ;;  %1161 = vmatpush3.bf16.msra.mxu1 %v1296_v1  ;;  %v1299_v4 = vld [vmem:[%s475_s22 + $0x8] sm:$0xff]   ;;  %s470_s24 = scalar_lea.vmem %s1868_s0, %s1101_s12  ;;  %s491_s22 = scalar_lea.vmem %s1823_s5, %s1644_s29 }
  0x36   : > { %1162 = vmatprep.subr.bf16.mxu1 %v1458_v0  ;;  %1153 = vmatpush3.bf16.msra.mxu0 %v1297_v2  ;;  %v500_v5 = vld [vmem:[%s470_s24] sm:$0xff]  ;;  %s488_s25 = scalar_lea.vmem %s1822_s4, %s1644_s29  ;;  %v1301_v24 = vld [vmem:[%s1662_s15 + $0x8] sm:$0xff]   ;;  %s1108_s16 = sshll.u32 %s1644_s29, 2 }
  0x37   : > { %1154 = vmatprep.subr.bf16.mxu0 %v1458_v0  ;;  %v501_v6 = vpack.c.bf16 %v500_v5, %v500_v5  ;;  %v1113_v7 = vld [vmem:[%s491_s22] ss:$0 sm:$0xff]  ;;  %s498_s21 = scalar_lea.vmem %s1825_s7, %s1108_s16  ;;  %s1841_s22 = sand.u32 1, %s1420_s14  }
  0x38   : > { %v1109_v8 = vld [vmem:[%s488_s25] ss:$0 sm:$0xff]  ;;  %s1710_s26 = sshll.u32 %s1841_s22, 3  ;;  %s459_s11 = scalar_lea.vmem [#allocation2], %s1640_s28 }
  0x39   : > { %1163 = vmatpush3.bf16.msra.mxu1 %v1298_v3  ;;  %v1300_v23 = vld [vmem:[%s1662_s15] sm:$0xff]   ;;  %s1842_s29 = scalar_lea.vmem [#allocation4], %s1710_s26 }
  0x3a   : > { %1155 = vmatpush3.bf16.msra.mxu0 %v1299_v4  ;;  %1176 = vmatprep.subr.bf16.mxu1 %v1458_v0  ;;  %v814_v47 = vld [vmem:[%s498_s21] sm:$0xf] }
  0x3b   : > { %1168 = vmatprep.subr.bf16.mxu0 %v1458_v0  ;;  %v819_v48 = vsel %vm769_vm4, %v814_v47, 0 }
  0x3c   : > { %1165 = vmatmul.mubr.msk.bf16.vlgmr.msra.gmra.mrb[0].mxu1 %vm525_vm1, %v501_v6 }
  0x3d   : > { %1157 = vmatmul.mubr.msk.bf16.vlgmr.msra.gmra.mrb[0].mxu0 %vm525_vm1, %v501_v6  ;;  %1178 = vmatprep.mubr.msk.bf16.mxu1 %vm1459_vm0, %v1458_v0 }
  0x3e   : > { %1172 = vmatprep.mubr.msk.bf16.mxu0 %vm1459_vm0, %v1458_v0  ;;  %1169 = vmatpush3.bf16.msra.mxu0 %v1300_v23 }
  0x3f   : > { %1170 = vmatprep.subr.bf16.mxu0 %v1458_v0 }
  0x42   : > { %1171 = vmatpush3.bf16.msra.mxu0 %v1301_v24 }
  0x43   : > { %1182 = vmatprep.subr.bf16.mxu0 %v1458_v0 }
  0x45   : > { %1173 = vmatmul.mubr.msk.bf16.vlgmr.msra.gmra.mrb[4].mxu0 %vm525_vm1, %v501_v6 }
  0x46   : > { %1184 = vmatprep.mubr.msk.bf16.mxu0 %vm1459_vm0, %v1458_v0 }
 0x10f   : > { %v626_v9 = vpop.f32.mrb[0].mxu1 }
 0x110   : > { %v627_v10 = vadd.f32 %v1113_v7, %v626_v9  ;;  %v1166_v11 = vpop.f32.mrb[1].mxu1  ;;  %v563_v12 = vpop.f32.mrb[0].mxu0 }
 0x111   : > { %v629_v13 = vpop.f32.mrb[2].mxu1  ;;  %v564_v14 = vadd.f32 %v1109_v8, %v563_v12  ;;  %v1158_v15 = vpop.f32.mrb[1].mxu0 }
 0x112   : > { %v697_v16 = vpack.c.bf16 %v627_v10, %v627_v10  ;;  %v1167_v17 = vpop.f32.mrb[3].mxu1  ;;  %v566_v18 = vpop.f32.mrb[2].mxu0 }
 0x113   : > { %v1159_v19 = vpop.f32.mrb[3].mxu0  ;;  %v695_v21 = vmul.f32 0.35355338, %v564_v14 }
 0x114   : > { %v703_v20 = vsel %vm698_vm2, %v697_v16, 0 }
 0x115   : > { %1177 = vmatpush3.bf16.xpose.msra.mxu1 %v703_v20  ;;  %v696_v22 = vpack.c.bf16 %v695_v21, %v695_v21 }
 0x116   : > { %1188 = vmatprep.subr.bf16.mxu1 %v1458_v0 }
 0x118   : > { %v689_v39 = vpop.f32.mrb[4].mxu0 }
 0x119   : > { %v1174_v40 = vpop.f32.mrb[5].mxu0  ;;  %v690_v44 = vadd.f32 %v1117_v42, %v689_v39 }
 0x11a   : > { %v692_v41 = vpop.f32.mrb[6].mxu0 }
 0x11b   : > { %v1175_v43 = vpop.f32.mrb[7].mxu0  ;;  %v765_v45 = vpack.c.bf16 %v690_v44, %v690_v44 }
 0x11c   : > { %1179 = vmatmul.mubr.msk.bf16.vlgmr.msra.gmra.mrb[4].mxu1 %vm698_vm2, %v696_v22 }
 0x11d   : > { %1190 = vmatprep.mubr.msk.bf16.mxu1 %vm1459_vm0, %v1458_v0  ;;  %v771_v46 = vsel %vm769_vm4, %v765_v45, 0  ;;  %1189 = vmatpush3.bf16.msra.mxu1 %v819_v48 }
 0x11e   : > { %1183 = vmatpush3.bf16.msra.mxu0 %v771_v46 }
 0x1ef   : > { %v739_v28 = vpop.f32.mrb[4].mxu1 }
 0x1f0   : > { %v750_v29 = vsel %vm749_vm3, -1e+09, %v739_v28  ;;  %v1180_v30 = vpop.f32.mrb[5].mxu1 }
 0x1f1   : > { %v742_v31 = vpop.f32.mrb[6].mxu1  ;;  %v751_v32 = vsel %vm698_vm2, %v750_v29, -inf }
 0x1f2   : > { %752 = vmax.xlane.f32.xlu0 %v751_v32  ;;  %v1181_v33 = vpop.f32.mrb[7].mxu1 }
 0x27f   : > { %v753_v34 = vpop.xlane.xlu0 %752 }
 0x280   : > { %v754_v35 = vsub.f32 %v750_v29, %v753_v34 }
 0x282   : > { %v755_v36 = vmul.f32 1.442695, %v754_v35 }
 0x284   : > { %1302 = vpow2.f32 %v755_v36 }
 0x28e   : > { %v1303_v37 = vpop.eup %1302 }
 0x28f   : > { %v757_v38 = vsel %vm698_vm2, %v1303_v37, 0.0 }
 0x290   : > { %758 = vadd.xlane.f32.xlu0 %v757_v38 }
 0x31d   : > { %v759_v49 = vpop.xlane.xlu0 %758 }
 0x31e   : > { %1304 = vrcp.f32 %v759_v49 }
 0x328   : > { %v1305_v50 = vpop.eup %1304 }
 0x329   : > { %v761_v51 = vmul.f32 %v1305_v50, %v1303_v37 }
 0x32b   : > { %v762_v52 = vsel %vm698_vm2, %v761_v51, 0.0  ;;  %v764_v53 = vpack.c.bf16 %v761_v51, %v761_v51 }
 0x32c   : > { %763 = vst [vmem:[%s1842_s29] sm:$0xff] %v762_v52 }
 0x32d   : > { %1185 = vmatmul.mubr.msk.bf16.vlgmr.msra.gmra.mrb[8].mxu0 %vm698_vm2, %v764_v53 }
 0x400   : > { %v807_v54 = vpop.f32.mrb[8].mxu0 }
 0x401   : > { %v813_v55 = vpack.c.bf16 %v807_v54, %v807_v54  ;;  %v1186_v56 = vpop.f32.mrb[9].mxu0 }
 0x402   : > { %v810_v57 = vpop.f32.mrb[10].mxu0 }
 0x403   : > { %v1187_v58 = vpop.f32.mrb[11].mxu0  ;;  %1191 = vmatmul.mubr.msk.bf16.vlgmr.msra.gmra.mrb[8].mxu1 %vm698_vm2, %v813_v55 }
 0x4d3   : > { %864 = sbr.rel (%p1124_p6) target bundleno = 1242 (0x4da), region = 60 }
 0x4d6   : > { %v855_v59 = vpop.f32.mrb[8].mxu1 }
 0x4d7   : > { %v1192_v60 = vpop.f32.mrb[9].mxu1  ;;  %v872_v0 = vadd.f32 (!%p1124_p6), %v1125_v63, %v855_v59 }
 0x4d8   : > { %v858_v61 = vpop.f32.mrb[10].mxu1 }
 0x4d9   : > { %v1193_v62 = vpop.f32.mrb[11].mxu1  ;;  %873 = vst.msk [vmem:[%s459_s11] sm:$0xff] (!%p1124_p6), %vm525_vm1, %v872_v0 }
 0x4da PF: > { %p1126_p8 = scmp.eq.s32.totalorder %s1440_s19, 0 }
 0x4dc   : > { %877 = sbr.rel (%p1126_p8) target bundleno = 1252 (0x4e4), region = 64 }
 0x4e0   : > { %v878_v1 = vld [vmem:[%s459_s11] sm:$0xff] (!%p1126_p8) }
 0x4e1   : > { %v879_v2 = vadd.f32 (!%p1126_p8), %v878_v1, %v855_v59 }
 0x4e3   : > { %880 = vst.msk [vmem:[%s459_s11] sm:$0xff] %vm525_vm1, %v879_v2 }
 0x4e4 PF: > { %s1129_s12 = sshll.u32 %s1444_s20, 7  ;;  %s1870_s24 = sld [smem:[#allocation22_spill]] }
 0x4e5   : > { %s900_s21 = sshll.u32 %s459_s11, 4  ;;  %s1871_s25 = sand.u32 1, %s1432_s17   ;;  %s901_s21 = int_to_ptr.vmem [resolvable:$true] %s900_s21 }
 0x4e6   : > { %s882_s15 = scalar_lea.sflag [#allocation3], %s1871_s25  ;;  %s1306_s22 = scalar_lea.vmem %s901_s21, 128 }
 0x4e7   : > { %p1307_p9 = scmp.ne.s32.totalorder %s901_s21, %s1306_s22  ;;  %s1460_s29 = smov [#allocation2]  }
 0x4e8   : > { %s1310_s0 = sshll.u32 %s1460_s29, 4  ;;  %s1311_s0 = int_to_ptr.vmem [resolvable:$false] %s1310_s0 }
 0x4e9   : > { %p1308_p10 = pnand %p1307_p9, %p1588_p3  ;;  %s1312_s1 = scalar_lea.vmem %s1311_s0, 256 }
 0x4ea   : > { %s1730_s18 = scalar_lea.hbm %s1870_s24, %s1129_s12  ;;  %p1313_p0 = scmp.lt.s32.totalorder %s901_s21, %s1311_s0 }
 0x4eb   : > { %p1309_p11 = pneg %p1308_p10  ;;  %p1314_p1 = scmp.lt.s32.totalorder %s1312_s1, %s1306_s22 }
 0x4ed   : > { %p1315_p4 = por %p1314_p1, %p1313_p0 }
 0x4ef   : > { %p1316_p2 = pnand %p1315_p4, %p1309_p11 }
 0x4f1   : > { %1319 = shalt.err (!%p1316_p2)
}
 0x4f2   : > { %s1320_s11 = scalar_lea.hbm %s1730_s18, 128  ;;  %s1324_s29 = scalar_lea.hbm %s1870_s24, 256 }
 0x4f3   : > { %p1321_p5 = scmp.ne.s32.totalorder %s1730_s18, %s1320_s11  ;;  %p1325_p9 = scmp.lt.u32.totalorder %s1730_s18, %s1870_s24 }
 0x4f4   : > { %p1326_p10 = scmp.lt.u32.totalorder %s1324_s29, %s1320_s11  ;;  %p1328_p0 = scmp.lt.u32.totalorder %s1320_s11, %s1730_s18 }
 0x4f5   : > { %p1322_p6 = pnand %p1321_p5, %p1588_p3 }
 0x4f6   : > { %p1327_p11 = por %p1326_p10, %p1325_p9 }
 0x4f7   : > { %p1323_p8 = pneg %p1322_p6 }
 0x4f8   : > { %p1329_p1 = por %p1328_p0, %p1327_p11 }
 0x4fa   : > { %p1330_p4 = pnand %p1329_p1, %p1323_p8 }
 0x4fc   : > { %1333 = shalt.err (!%p1330_p4)
}
 0x4fd   : > { %1194 = dma.vmem_to_hbm [thread:$0]  (%p1588_p3), %s901_s21, 128, %s1730_s18, %s882_s15  }
 0x4fe   : > { %s1130_s1 = sshll.u32 %s1444_s20, 2  ;;  %s1872_s22 = scalar_lea.vmem [#allocation4], %s1710_s26 }
 0x4ff   : > { %s915_s25 = sshll.u32 %s1872_s22, 4  ;;  %s911_s12 = sadd.s32 %s1440_s19, %s1130_s1  ;;  %s1755_s25 = int_to_ptr.vmem [resolvable:$true] %s915_s25 }
 0x500   : > { %s1131_s11 = sshll.u32 %s911_s12, 7  ;;  %s1873_s28 = sld [smem:[#allocation23_spill]] }
 0x501   : > { %s1874_s0 = sand.u32 1, %s1420_s14   ;;  %s1334_s3 = scalar_lea.vmem %s1755_s25, 128 }
 0x502   : > { %s887_s2 = scalar_lea.sflag [#allocation5], %s1874_s0  ;;  %p1335_p2 = scmp.ne.s32.totalorder %s1755_s25, %s1334_s3 }
 0x503   : > { %s1461_s20 = smov [#allocation4]  }
 0x504   : > { %p1336_p3 = pnand %p1335_p2, %p1617_p12  ;;  %s1338_s26 = sshll.u32 %s1461_s20, 4  ;;  %s1339_s26 = int_to_ptr.vmem [resolvable:$false] %s1338_s26 }
 0x505   : > { %s1340_s19 = scalar_lea.vmem %s1339_s26, 256  ;;  %p1341_p6 = scmp.lt.s32.totalorder %s1755_s25, %s1339_s26 }
 0x506   : > { %s913_s16 = scalar_lea.hbm %s1873_s28, %s1131_s11  ;;  %p1337_p5 = pneg %p1336_p3 }
 0x507   : > { %p1342_p8 = scmp.lt.s32.totalorder %s1340_s19, %s1334_s3 }
 0x509   : > { %p1343_p9 = por %p1342_p8, %p1341_p6 }
 0x50b   : > { %p1344_p10 = pnand %p1343_p9, %p1337_p5 }
 0x50d   : > { %1347 = shalt.err (!%p1344_p10)
}
 0x50e   : > { %s1348_s18 = scalar_lea.hbm %s913_s16, 128  ;;  %s1352_s1 = scalar_lea.hbm %s1873_s28, 1024 }
 0x50f   : > { %p1349_p11 = scmp.ne.s32.totalorder %s913_s16, %s1348_s18  ;;  %p1353_p4 = scmp.lt.u32.totalorder %s913_s16, %s1873_s28 }
 0x510   : > { %p1354_p2 = scmp.lt.u32.totalorder %s1352_s1, %s1348_s18  ;;  %p1356_p13 = scmp.lt.u32.totalorder %s1348_s18, %s913_s16 }
 0x511   : > { %p1350_p0 = pnand %p1349_p11, %p1617_p12 }
 0x512   : > { %p1355_p3 = por %p1354_p2, %p1353_p4 }
 0x513   : > { %p1351_p1 = pneg %p1350_p0 }
 0x514   : > { %p1357_p6 = por %p1356_p13, %p1355_p3 }
 0x516   : > { %p1358_p5 = pnand %p1357_p6, %p1351_p1 }
 0x518   : > { %1361 = shalt.err (!%p1358_p5)
}
 0x519   : > { %1195 = dma.vmem_to_hbm [thread:$0]  (%p1617_p12), %s1755_s25, 128, %s913_s16, %s887_s2  }
 0x51a PF: > { %s1875_s3 = sld [smem:[#allocation9_spill]]  ;;  %p1205_p8 = scmp.ge.s32.totalorder %s1456_s23, 2 }
 0x51c   : > { %p1199_p9 = pnand %p1205_p8, %p1605_p7 }
 0x520   : > { %s927_s11 = sand.u32 1, %s1875_s3  }
 0x521   : > { %s928_s27 = scalar_lea.sflag [#allocation3], %s927_s11 }
 0x522   : > { %1407 = dma.done.wait (!%p1199_p9), %s928_s27, 128  }
 0x523   : > { %1409 = vsyncadd (!%p1199_p9), %s928_s27, 4294967168  ;;  %s936_s29 = sand.u32 1, %s1416_s13   ;;  %p1876_p13 = scmp.ne.s32.totalorder %s1864_s30, 0 }
 0x524   : > { %s937_s0 = scalar_lea.sflag [#allocation5], %s936_s29 }
 0x525   : > { %p1202_p10 = pnand %p1205_p8, %p1876_p13 }
 0x527   : > { %1411 = dma.done.wait (!%p1202_p10), %s937_s0, 128  }
 0x528   : > { %1413 = vsyncadd (!%p1202_p10), %s937_s0, 4294967168  ;;  %s27_s23 = sadd.s32 1, %s1456_s23   ;;  %s1877_s2 = sld [smem:[#allocation8_spill]] }
 0x529   : > { %p24_p12 = scmp.ge.s32.totalorder %s27_s23, 10   ;;  %s1878_s15 = sld [smem:[#allocation17_spill]] }
 0x52a   : > { %s1879_s9 = sld [smem:[#allocation10_spill]]  ;;  %s1880_s18 = sld [smem:[#allocation16_spill]] }
 0x52b   : > { %s1881_s19 = sld [smem:[#allocation11_spill]]  ;;  %s1882_s20 = sld [smem:[#allocation12_spill]] }
 0x52c   : > { %s1883_s21 = sld [smem:[#allocation13_spill]]  ;;  %s1884_s22 = sld [smem:[#allocation15_spill]] }
 0x52d   : > { %s1885_s13 = smov %s1420_s14  ;;  %s1887_s16 = smov %s1432_s17 }
 0x52e   : > { %s1886_s14 = smov %s1877_s2  ;;  %26 = sbr.rel (!%p24_p12) target bundleno = 16 (0x10), region = 137 }
 0x530   : > { %s1888_s17 = smov %s1879_s9 }
 0x535   :  { %942 = vsyncpa [#allocation3], 1 }
 0x536   :  { %944 = vsyncpa [#allocation3 + $0x1], 1 }
 0x537   :  { %945 = vsyncpa [#allocation5], 1 }
 0x538   :  { %947 = vsyncpa [#allocation5 + $0x1], 1 }

</bundles_post_ra>
